<compile_context>
chip_gen: v6e
topology: v6e:2x2x1
jax: 0.10.0
libtpu: 0.0.40
codegen_flags: <defaults>
</compile_context>

<pallas_src>
import functools

import jax
import jax.numpy as jnp
from jax.experimental import pallas as pl
from jax.experimental.pallas import tpu as pltpu


# ---------------------------------------------------------------------------
# Kernel bodies
# ---------------------------------------------------------------------------

def _layernorm_kernel(x_ref, w_ref, b_ref, o_ref, *, eps, inv_width):
    """Standard path: one LayerNorm row per block row (hidden on lanes).

    Fused single reduction pass: sum(x) and sum(x*x) in one sweep (f32
    accumulation), mean/var derived from them, then one elementwise pass.
    Note: E[x^2]-E[x]^2 can cancel for inputs with very large means; f32
    accumulation keeps activation-scale data well inside 1e-5.
    """
    xf = x_ref[...].astype(jnp.float32)
    u = jnp.sum(xf, axis=-1, keepdims=True) * inv_width
    ex2 = jnp.sum(xf * xf, axis=-1, keepdims=True) * inv_width
    var = jnp.maximum(ex2 - u * u, 0.0)
    inv = jax.lax.rsqrt(var + eps)                    # eps inside sqrt (TF style)
    o_ref[...] = ((xf - u) * inv * w_ref[...] + b_ref[...]).astype(o_ref.dtype)


def _layernorm_packed_kernel(x_ref, m_ref, w_ref, b_ref, o_ref, *, eps):
    """Lane-dense path for small hidden: k = 128 // hidden LayerNorm rows are
    packed into each 128-wide lane row.  The segmented mean / mean-of-squares
    (already broadcast back to every lane) are a single (tile, P) @ (P, P)
    matmul with a block-diagonal averaging matrix — the MXU is otherwise idle
    and every VPU op / output store stays fully lane-dense.
    """
    xf = x_ref[...].astype(jnp.float32)
    m = m_ref[...]                                    # (P, P) block-diagonal / hidden
    u = jnp.dot(xf, m, preferred_element_type=jnp.float32)
    ex2 = jnp.dot(xf * xf, m, preferred_element_type=jnp.float32)
    var = jnp.maximum(ex2 - u * u, 0.0)
    inv = jax.lax.rsqrt(var + eps)
    o_ref[...] = ((xf - u) * inv * w_ref[...] + b_ref[...]).astype(o_ref.dtype)


# ---------------------------------------------------------------------------
# Tiling helpers
# ---------------------------------------------------------------------------

def _sublane_multiple(dtype):
    itemsize = jnp.dtype(dtype).itemsize
    if itemsize >= 4:
        return 8
    if itemsize == 2:
        return 16
    return 32


def _vmem_capacity_bytes():
    try:
        return int(pltpu.get_tpu_info().vmem_capacity_bytes)
    except Exception:
        # Conservative fallback: v7x has 64 MiB of VMEM per TensorCore.
        return 64 * 1024 * 1024


def _legalize_row_tile(row_tile, rows, dtype):
    sub = _sublane_multiple(dtype)
    if row_tile >= rows:
        return rows                # block == full row extent: always a legal tile
    return max(sub, (row_tile // sub) * sub)


def _choose_row_tile(rows, width, dtype):
    itemsize = jnp.dtype(dtype).itemsize
    sub = _sublane_multiple(dtype)
    capacity = _vmem_capacity_bytes()
    # Per-row VMEM footprint: double-buffered input + output block plus ~3
    # block-sized f32 temporaries materialized by the fused kernel body.
    per_row_bytes = width * (4 * itemsize + 12)
    budget = capacity // 2                            # leave half of VMEM free
    max_rows_by_vmem = max(sub, budget // max(per_row_bytes, 1))
    # Block target scales with VMEM capacity: ~8 MiB on 128 MiB parts
    # (v5e/v6e), ~4 MiB on the 64 MiB v7x; amortizes the ~0.35 us/grid-step
    # overhead while leaving headroom for double-buffering + f32 temps.
    target_bytes = min(max(capacity // 16, 2 * 1024 * 1024), 16 * 1024 * 1024)
    target_rows = max(sub, target_bytes // max(width * itemsize, 1))
    row_tile = min(target_rows, max_rows_by_vmem)
    return _legalize_row_tile(row_tile, rows, dtype)
    # TODO(synk): no hidden-axis tiling — for extremely large hidden (f32 ~1M)
    # even a single sublane-row block exceeds VMEM; needs a two-pass lane split.


# ---------------------------------------------------------------------------
# Launch wrapper
# ---------------------------------------------------------------------------

def _launch(kernel_body, x2, params, row_tile):
    rows, width = x2.shape
    dtype = x2.dtype

    if row_tile is None:
        row_tile = _choose_row_tile(rows, width, dtype)
    else:
        row_tile = _legalize_row_tile(int(row_tile), rows, dtype)

    n_blocks = pl.cdiv(rows, row_tile)

    itemsize = jnp.dtype(dtype).itemsize
    block_bytes = row_tile * width * itemsize
    f32_temporaries = 3 * row_tile * width * 4
    param_bytes = sum(int(p.size) * jnp.dtype(p.dtype).itemsize for p in params)
    needed = 4 * block_bytes + f32_temporaries + param_bytes + (2 << 20)
    vmem_limit = int(min(_vmem_capacity_bytes(), max(needed, 16 << 20)))

    in_specs = [pl.BlockSpec((row_tile, width), lambda i: (i, 0))]
    in_specs += [pl.BlockSpec(p.shape, lambda i: (0, 0)) for p in params]

    return pl.pallas_call(
        kernel_body,
        out_shape=jax.ShapeDtypeStruct((rows, width), dtype),
        grid_spec=pltpu.PrefetchScalarGridSpec(
            num_scalar_prefetch=0,
            grid=(n_blocks,),
            in_specs=in_specs,
            out_specs=pl.BlockSpec((row_tile, width), lambda i: (i, 0)),
        ),
        # TODO(synk): switch the row axis to pltpu.CORE_PARALLEL on v7x (2 TCs
        # per chip) once verified to lower cleanly on the target toolchain.
        compiler_params=pltpu.CompilerParams(
            dimension_semantics=("parallel",),
            vmem_limit_bytes=vmem_limit,
        ),
    )(x2, *params)


def layer_norm(x, weight, bias, eps=1e-12, row_tile=None):
    """TF-style LayerNorm over the last axis.

    x: (..., hidden); weight/bias: (hidden,). Returns same shape/dtype as x.
    `row_tile` (optional) is the number of kernel-layout rows per block.
    """
    orig_shape = x.shape
    hidden = orig_shape[-1]
    x2 = x.reshape(-1, hidden)
    rows = x2.shape[0]
    if rows == 0:
        return x

    # Pre-cast parameters once; the resident (1, width) blocks are then never
    # re-cast inside the kernel on each grid step.
    w32 = weight.astype(jnp.float32)
    b32 = bias.astype(jnp.float32)

    # Lane-dense repacking for small hidden: pack k = 128 // hidden rows into
    # each 128-lane-wide row so VPU lanes and output stores are fully dense.
    pack = 1
    if hidden < 128 and 128 % hidden == 0:
        k = 128 // hidden
        if rows % k == 0:
            pack = k

    if pack > 1:
        width = pack * hidden
        xp = x2.reshape(rows // pack, width)
        seg = jnp.arange(width, dtype=jnp.int32) // hidden
        m = (seg[:, None] == seg[None, :]).astype(jnp.float32) * (1.0 / hidden)
        wp = jnp.tile(w32, pack).reshape(1, width)
        bp = jnp.tile(b32, pack).reshape(1, width)
        out = _launch(
            functools.partial(_layernorm_packed_kernel, eps=eps),
            xp, (m, wp, bp), row_tile)
    else:
        out = _launch(
            functools.partial(_layernorm_kernel, eps=eps, inv_width=1.0 / hidden),
            x2, (w32.reshape(1, hidden), b32.reshape(1, hidden)), row_tile)

    return out.reshape(orig_shape)


def layer_norm_ref(x, weight, bias, eps=1e-12):
    u = jnp.mean(x, axis=-1, keepdims=True)
    s = jnp.mean((x - u) ** 2, axis=-1, keepdims=True)
    return weight * ((x - u) / jnp.sqrt(s + eps)) + bias


if __name__ == "__main__":
    key = jax.random.PRNGKey(0)

    # Shape implied by the module: (batch, seq, hidden) with hidden=32.
    batch, seq, hidden = 2, 8, 32
    weight = jnp.ones((hidden,), dtype=jnp.float32)   # nn.Parameter(torch.ones(H))
    bias = jnp.zeros((hidden,), dtype=jnp.float32)    # nn.Parameter(torch.zeros(H))
    x = jax.random.normal(key, (batch, seq, hidden), dtype=jnp.float32)

    out = jax.block_until_ready(layer_norm(x, weight, bias))
    ref = layer_norm_ref(x, weight, bias)
    assert out.shape == x.shape and out.dtype == x.dtype
    assert jnp.allclose(out, ref, atol=1e-4, rtol=1e-4), "mismatch (packed path)"

    # Lane-dense (packed) path with a multi-block grid and a masked tail block.
    x2 = jax.random.normal(jax.random.PRNGKey(1), (3, 40, hidden), jnp.float32)
    w2 = jax.random.normal(jax.random.PRNGKey(2), (hidden,), jnp.float32)
    b2 = jax.random.normal(jax.random.PRNGKey(3), (hidden,), jnp.float32)
    o2 = jax.block_until_ready(layer_norm(x2, w2, b2, row_tile=8))
    assert jnp.allclose(o2, layer_norm_ref(x2, w2, b2), atol=1e-4, rtol=1e-4), \
        "mismatch (packed path, partial block)"

    # Standard path (hidden multiple of 128) with an uneven row count
    # (exercises the no-pad partial last block).
    h3 = 256
    x3 = jax.random.normal(jax.random.PRNGKey(4), (5, 40, h3), jnp.float32)
    w3 = jax.random.normal(jax.random.PRNGKey(5), (h3,), jnp.float32)
    b3 = jax.random.normal(jax.random.PRNGKey(6), (h3,), jnp.float32)
    o3 = jax.block_until_ready(layer_norm(x3, w3, b3, row_tile=64))
    assert jnp.allclose(o3, layer_norm_ref(x3, w3, b3), atol=1e-4, rtol=1e-4), \
        "mismatch (standard path)"

    print("KERNEL_OK")
</pallas_src>

<mosaic_0001>
module attributes {stable_mosaic.version = 11 : i64} {
  func.func @_layernorm_packed_kernel(%arg0: i32, %arg1: memref<4x128xf32, #tpu.memory_space<vmem>>, %arg2: memref<128x128xf32, #tpu.memory_space<vmem>>, %arg3: memref<1x128xf32, #tpu.memory_space<vmem>>, %arg4: memref<1x128xf32, #tpu.memory_space<vmem>>, %arg5: memref<4x128xf32, #tpu.memory_space<vmem>>) attributes {dimension_semantics = [#tpu.dimension_semantics<parallel>], iteration_bounds = array<i64: 1>, scalar_prefetch = 0 : i64, scratch_operands = 0 : i64, tpu.core_type = #tpu.core_type<tc>, window_params = [{transform_indices = @transform_0, window_bounds = array<i64: 4, 128>}, {pipeline_mode = #tpu.pipeline_mode<synchronous>, transform_indices = @transform_1, window_bounds = array<i64: 128, 128>}, {pipeline_mode = #tpu.pipeline_mode<synchronous>, transform_indices = @transform_2, window_bounds = array<i64: 1, 128>}, {pipeline_mode = #tpu.pipeline_mode<synchronous>, transform_indices = @transform_3, window_bounds = array<i64: 1, 128>}, {transform_indices = @transform_4, window_bounds = array<i64: 4, 128>}]} {
    %c0 = arith.constant 0 : index
    %c0_0 = arith.constant 0 : index
    %0 = vector.load %arg1[%c0, %c0_0] : memref<4x128xf32, #tpu.memory_space<vmem>>, vector<4x128xf32>
    %c0_1 = arith.constant 0 : index
    %c0_2 = arith.constant 0 : index
    %1 = vector.load %arg2[%c0_1, %c0_2] : memref<128x128xf32, #tpu.memory_space<vmem>>, vector<128x128xf32>
    %cst = arith.constant dense<0.000000e+00> : vector<4x128xf32>
    %2 = tpu.matmul %0, %1, %cst {dimension_numbers = #tpu.dot_dimension_numbers<[1], [0], [0], [1], [0, 0, 1, 1], [], []>} : vector<4x128xf32>, vector<128x128xf32>, vector<4x128xf32> -> vector<4x128xf32>
    %3 = arith.mulf %0, %0 : vector<4x128xf32>
    %cst_3 = arith.constant dense<0.000000e+00> : vector<4x128xf32>
    %4 = tpu.matmul %3, %1, %cst_3 {dimension_numbers = #tpu.dot_dimension_numbers<[1], [0], [0], [1], [0, 0, 1, 1], [], []>} : vector<4x128xf32>, vector<128x128xf32>, vector<4x128xf32> -> vector<4x128xf32>
    %5 = arith.mulf %2, %2 : vector<4x128xf32>
    %6 = arith.subf %4, %5 : vector<4x128xf32>
    %cst_4 = arith.constant 0.000000e+00 : f32
    %7 = vector.broadcast %cst_4 : f32 to vector<4x128xf32>
    %8 = arith.maximumf %6, %7 : vector<4x128xf32>
    %cst_5 = arith.constant 9.99999996E-13 : f32
    %9 = vector.broadcast %cst_5 : f32 to vector<4x128xf32>
    %10 = arith.addf %8, %9 : vector<4x128xf32>
    %11 = math.rsqrt %10 : vector<4x128xf32>
    %12 = arith.subf %0, %2 : vector<4x128xf32>
    %13 = arith.mulf %12, %11 : vector<4x128xf32>
    %c0_6 = arith.constant 0 : index
    %c0_7 = arith.constant 0 : index
    %14 = vector.load %arg3[%c0_6, %c0_7] : memref<1x128xf32, #tpu.memory_space<vmem>>, vector<1x128xf32>
    %15 = vector.broadcast %14 : vector<1x128xf32> to vector<4x128xf32>
    %16 = arith.mulf %13, %15 : vector<4x128xf32>
    %c0_8 = arith.constant 0 : index
    %c0_9 = arith.constant 0 : index
    %17 = vector.load %arg4[%c0_8, %c0_9] : memref<1x128xf32, #tpu.memory_space<vmem>>, vector<1x128xf32>
    %18 = vector.broadcast %17 : vector<1x128xf32> to vector<4x128xf32>
    %19 = arith.addf %16, %18 : vector<4x128xf32>
    %c0_10 = arith.constant 0 : index
    %c0_11 = arith.constant 0 : index
    %20 = vector.load %arg5[%c0_10, %c0_11] : memref<4x128xf32, #tpu.memory_space<vmem>>, vector<4x128xf32>
    tpu.vector_store %arg5[%c0_10, %c0_11], %19 {strides = array<i32>} : memref<4x128xf32, #tpu.memory_space<vmem>>, vector<4x128xf32>,
    return
  }
  func.func @transform_0(%arg0: i32) -> (i32, i32) {
    %c0_i32 = arith.constant 0 : i32
    %c0_i32_0 = arith.constant 0 : i32
    return %arg0, %c0_i32 : i32, i32
  }
  func.func @transform_1(%arg0: i32) -> (i32, i32) {
    %c0_i32 = arith.constant 0 : i32
    %c0_i32_0 = arith.constant 0 : i32
    %c0_i32_1 = arith.constant 0 : i32
    return %c0_i32, %c0_i32_0 : i32, i32
  }
  func.func @transform_2(%arg0: i32) -> (i32, i32) {
    %c0_i32 = arith.constant 0 : i32
    %c0_i32_0 = arith.constant 0 : i32
    %c0_i32_1 = arith.constant 0 : i32
    return %c0_i32, %c0_i32_0 : i32, i32
  }
  func.func @transform_3(%arg0: i32) -> (i32, i32) {
    %c0_i32 = arith.constant 0 : i32
    %c0_i32_0 = arith.constant 0 : i32
    %c0_i32_1 = arith.constant 0 : i32
    return %c0_i32, %c0_i32_0 : i32, i32
  }
  func.func @transform_4(%arg0: i32) -> (i32, i32) {
    %c0_i32 = arith.constant 0 : i32
    %c0_i32_0 = arith.constant 0 : i32
    return %arg0, %c0_i32 : i32, i32
  }
}

</mosaic_0001>

<bundles_post_ra>
// kernel: tpu_custom_call.1
= control target key start
LH: loop header
LB: loop body
LE: loop exit
PB: predicated region body
PF: predicated region fallthrough
CT: control target
= control target key end

     0   :  { %9 = vsyncpa [#allocation3], 0  ;;  %s504_s0 = inlined_call_operand.hbm [shape: f32[4,128], index: 0, kind: input, shape index: {}]   ;;  %s505_s1 = inlined_call_operand.hbm [shape: f32[128,128], index: 1, kind: input, shape index: {}]   ;;  %s506_s2 = inlined_call_operand.vmem [shape: f32[1,128], index: 2, kind: input, shape index: {}]   ;;  %s507_s3 = inlined_call_operand.vmem [shape: f32[1,128], index: 3, kind: input, shape index: {}]   ;;  %s508_s4 = inlined_call_operand.hbm [shape: f32[4,128], index: 4, kind: output, shape index: {}]  }
   0x1   :  { %10 = vsyncpa [#allocation6], 0 }
   0x2   :  { %11 = vsyncpa [#allocation4], 0  ;;  %s423_s15 = smov [#allocation2]   ;;  %s424_s17 = smov [#allocation5]  }
   0x3   :  { %s18_s16 = sshll.u32 %s423_s15, 4  ;;  %s27_s18 = sshll.u32 %s424_s17, 4  ;;  %s19_s16 = int_to_ptr.vmem [resolvable:$true] %s18_s16  ;;  %s28_s18 = int_to_ptr.vmem [resolvable:$true] %s27_s18 }
   0x4   :  { %s365_s19 = scalar_lea.vmem %s19_s16, 64  ;;  %p370_p1 = scmp.lt.s32.totalorder %s19_s16, %s19_s16 }
   0x5   :  { %p366_p0 = scmp.ne.s32.totalorder %s19_s16, %s365_s19  ;;  %p371_p2 = scmp.lt.s32.totalorder %s365_s19, %s365_s19 }
   0x7   :  { %p372_p3 = por %p371_p2, %p370_p1 }
   0x9   :  { %p373_p4 = pnand %p372_p3, %p366_p0 }
   0xb   :  { %376 = shalt.err (!%p373_p4)
}
   0xc   :  { %21 = dma.hbm_to_vmem [thread:$0]  %s504_s0, 64, %s19_s16, [#allocation3]  }
   0xd   :  { %s385_s22 = scalar_lea.vmem %s28_s18, 2048  ;;  %p390_p6 = scmp.lt.s32.totalorder %s28_s18, %s28_s18 }
   0xe   :  { %p386_p5 = scmp.ne.s32.totalorder %s28_s18, %s385_s22  ;;  %p391_p7 = scmp.lt.s32.totalorder %s385_s22, %s385_s22 }
  0x10   :  { %p392_p8 = por %p391_p7, %p390_p6 }
  0x12   :  { %p393_p9 = pnand %p392_p8, %p386_p5 }
  0x14   :  { %396 = shalt.err (!%p393_p9)
}
  0x15   :  { %s425_s23 = smov 128   ;;  %s426_s24 = smov 8  }
  0x16   :  { %33 = dma.hbm_to_vmem [thread:$0]  %s505_s1, 2048, %s28_s18, [#allocation6], %s425_s23, %s425_s23, %s426_s24  }
  0x17   :  { %417 = dma.done.wait [#allocation3], 64  }
  0x18   :  { %418 = vsyncadd [#allocation3], 4294967232 }
  0x19   :  { %419 = dma.done.wait [#allocation6], 2048  }
  0x1a   :  { %420 = vsyncadd [#allocation6], 4294965248  ;;  %v427_v0 = vmov 0.0   ;;  %vm428_vm0 = vmmov 0   ;;  %v60_v1 = vld [vmem:[#allocation5 + $0x78] sm:$0xff]  ;;  %v59_v2 = vld [vmem:[#allocation5 + $0x70] sm:$0xff] }
  0x1b   :  { %278 = vmatprep.subr.mxu0 %v427_v0  ;;  %313 = vmatprep.subr.mxu1 %v427_v0  ;;  %v58_v3 = vld [vmem:[#allocation5 + $0x68] sm:$0xff]  ;;  %v57_v4 = vld [vmem:[#allocation5 + $0x60] sm:$0xff]  ;;  %v56_v5 = vld [vmem:[#allocation5 + $0x58] sm:$0xff]  ;;  %s429_s29 = smov [#allocation7]  }
  0x1c   :  { %310 = vmatprep.mubr.msk.f32.mxu0 %vm428_vm0, %v427_v0  ;;  %345 = vmatprep.mubr.msk.f32.mxu1 %vm428_vm0, %v427_v0  ;;  %v55_v6 = vld [vmem:[#allocation5 + $0x50] sm:$0xff]  ;;  %v54_v7 = vld [vmem:[#allocation5 + $0x48] sm:$0xff]  ;;  %v53_v8 = vld [vmem:[#allocation5 + $0x40] sm:$0xff]  ;;  %s232_s30 = sshll.u32 %s429_s29, 4  ;;  %s233_s30 = int_to_ptr.vmem [resolvable:$true] %s232_s30 }
  0x1d   :  { %279 = vmatpush3.msra.mxu0 %v60_v1  ;;  %314 = vmatpush3.msra.mxu1 %v60_v1  ;;  %v52_v9 = vld [vmem:[#allocation5 + $0x38] sm:$0xff]  ;;  %v51_v10 = vld [vmem:[#allocation5 + $0x30] sm:$0xff]  ;;  %v50_v11 = vld [vmem:[#allocation5 + $0x28] sm:$0xff]  ;;  %s397_s5 = scalar_lea.vmem %s233_s30, 64  ;;  %p402_p11 = scmp.lt.s32.totalorder %s233_s30, %s233_s30 }
  0x1e   :  { %280 = vmatprep.subr.mxu0 %v427_v0  ;;  %315 = vmatprep.subr.mxu1 %v427_v0  ;;  %v49_v12 = vld [vmem:[#allocation5 + $0x20] sm:$0xff]  ;;  %v48_v13 = vld [vmem:[#allocation5 + $0x18] sm:$0xff]  ;;  %v47_v14 = vld [vmem:[#allocation5 + $0x10] sm:$0xff]  ;;  %p398_p10 = scmp.ne.s32.totalorder %s233_s30, %s397_s5  ;;  %p403_p12 = scmp.lt.s32.totalorder %s397_s5, %s397_s5 }
  0x1f   :  { %281 = vmatpush3.msra.mxu0 %v59_v2  ;;  %316 = vmatpush3.msra.mxu1 %v59_v2  ;;  %v44_v15 = vld [vmem:[#allocation2] sm:$0xf]  ;;  %v46_v16 = vld [vmem:[#allocation5 + $0x8] sm:$0xff]  ;;  %v45_v17 = vld [vmem:[#allocation5] sm:$0xff] }
  0x20   :  { %282 = vmatprep.subr.mxu0 %v427_v0  ;;  %317 = vmatprep.subr.mxu1 %v427_v0  ;;  %v131_v18 = vmul.f32 %v44_v15, %v44_v15  ;;  %v242_v29 = vld [vmem:[%s506_s2] ss:$0 sm:$0xff]  ;;  %p404_p13 = por %p403_p12, %p402_p11 }
  0x21   :  { %283 = vmatpush3.msra.mxu0 %v58_v3  ;;  %318 = vmatpush3.msra.mxu1 %v58_v3  ;;  %v243_v31 = vld [vmem:[%s507_s3] ss:$0 sm:$0xff] }
  0x22   :  { %284 = vmatprep.subr.mxu0 %v427_v0  ;;  %319 = vmatprep.subr.mxu1 %v427_v0  ;;  %p405_p0 = pnand %p404_p13, %p398_p10 }
  0x23   :  { %285 = vmatpush3.msra.mxu0 %v57_v4  ;;  %320 = vmatpush3.msra.mxu1 %v57_v4 }
  0x24   :  { %286 = vmatprep.subr.mxu0 %v427_v0  ;;  %321 = vmatprep.subr.mxu1 %v427_v0 }
  0x25   :  { %287 = vmatpush3.msra.mxu0 %v56_v5  ;;  %322 = vmatpush3.msra.mxu1 %v56_v5 }
  0x26   :  { %288 = vmatprep.subr.mxu0 %v427_v0  ;;  %323 = vmatprep.subr.mxu1 %v427_v0 }
  0x27   :  { %289 = vmatpush3.msra.mxu0 %v55_v6  ;;  %324 = vmatpush3.msra.mxu1 %v55_v6 }
  0x28   :  { %290 = vmatprep.subr.mxu0 %v427_v0  ;;  %325 = vmatprep.subr.mxu1 %v427_v0 }
  0x29   :  { %291 = vmatpush3.msra.mxu0 %v54_v7  ;;  %326 = vmatpush3.msra.mxu1 %v54_v7 }
  0x2a   :  { %292 = vmatprep.subr.mxu0 %v427_v0  ;;  %327 = vmatprep.subr.mxu1 %v427_v0 }
  0x2b   :  { %293 = vmatpush3.msra.mxu0 %v53_v8  ;;  %328 = vmatpush3.msra.mxu1 %v53_v8 }
  0x2c   :  { %294 = vmatprep.subr.mxu0 %v427_v0  ;;  %329 = vmatprep.subr.mxu1 %v427_v0 }
  0x2d   :  { %295 = vmatpush3.msra.mxu0 %v52_v9  ;;  %330 = vmatpush3.msra.mxu1 %v52_v9 }
  0x2e   :  { %296 = vmatprep.subr.mxu0 %v427_v0  ;;  %331 = vmatprep.subr.mxu1 %v427_v0 }
  0x2f   :  { %297 = vmatpush3.msra.mxu0 %v51_v10  ;;  %332 = vmatpush3.msra.mxu1 %v51_v10 }
  0x30   :  { %298 = vmatprep.subr.mxu0 %v427_v0  ;;  %333 = vmatprep.subr.mxu1 %v427_v0 }
  0x31   :  { %299 = vmatpush3.msra.mxu0 %v50_v11  ;;  %334 = vmatpush3.msra.mxu1 %v50_v11 }
  0x32   :  { %300 = vmatprep.subr.mxu0 %v427_v0  ;;  %335 = vmatprep.subr.mxu1 %v427_v0 }
  0x33   :  { %301 = vmatpush3.msra.mxu0 %v49_v12  ;;  %336 = vmatpush3.msra.mxu1 %v49_v12 }
  0x34   :  { %302 = vmatprep.subr.mxu0 %v427_v0  ;;  %337 = vmatprep.subr.mxu1 %v427_v0 }
  0x35   :  { %303 = vmatpush3.msra.mxu0 %v48_v13  ;;  %338 = vmatpush3.msra.mxu1 %v48_v13 }
  0x36   :  { %304 = vmatprep.subr.mxu0 %v427_v0  ;;  %339 = vmatprep.subr.mxu1 %v427_v0 }
  0x37   :  { %305 = vmatpush3.msra.mxu0 %v47_v14  ;;  %340 = vmatpush3.msra.mxu1 %v47_v14 }
  0x38   :  { %306 = vmatprep.subr.mxu0 %v427_v0  ;;  %341 = vmatprep.subr.mxu1 %v427_v0 }
  0x39   :  { %307 = vmatpush3.msra.mxu0 %v46_v16  ;;  %342 = vmatpush3.msra.mxu1 %v46_v16 }
  0x3a   :  { %308 = vmatprep.subr.mxu0 %v427_v0  ;;  %343 = vmatprep.subr.mxu1 %v427_v0 }
  0x3b   :  { %309 = vmatpush3.msra.mxu0 %v45_v17  ;;  %344 = vmatpush3.msra.mxu1 %v45_v17 }
  0x3c   :  { %311 = vmatmul.mubr.f32.vlgmr.msra.gmra.mxu0 %v44_v15  ;;  %346 = vmatmul.mubr.f32.vlgmr.msra.gmra.mxu1 %v131_v18 }
  0xfc   :  { %v127_v19 = vpop.f32.mrf.mxu0  ;;  %v198_v20 = vpop.f32.mrf.mxu1 }
  0xfd   :  { %v202_v21 = vmul.f32 %v127_v19, %v127_v19  ;;  %v207_v27 = vsub.f32 %v44_v15, %v127_v19 }
  0xfe   :  { %v312_v22 = vpop.f32.mrf.mxu0  ;;  %v347_v23 = vpop.f32.mrf.mxu1 }
  0xff   :  { %v203_v24 = vsub.f32 %v198_v20, %v202_v21 }
 0x101   :  { %v204_v25 = vmax.f32 %v203_v24, 0.0 }
 0x103   :  { %v205_v26 = vadd.f32 1e-12, %v204_v25 }
 0x105   :  { %355 = vrsqrt.f32 %v205_v26 }
 0x112   :  { %v356_v28 = vpop.eup %355 }
 0x113   :  { %v208_v30 = vmul.f32 %v356_v28, %v207_v27 }
 0x115   :  { %v216_v32 = vmul.f32 %v242_v29, %v208_v30 }
 0x117   :  { %v224_v33 = vadd.f32 %v243_v31, %v216_v32 }
 0x119   :  { %225 = vst [vmem:[#allocation7] sm:$0xf] %v224_v33 }
 0x11a   :  { %408 = shalt.err (!%p405_p0)
}
 0x11b   :  { %235 = dma.vmem_to_hbm [thread:$0]  %s233_s30, 64, %s508_s4, [#allocation4]  }
 0x11c   :  { %421 = dma.done.wait [#allocation4], 64  }
 0x11d   :  { %422 = vsyncadd [#allocation4], 4294967232 }
 0x11e   :  { %239 = vsyncpa [#allocation3], 1 }
 0x11f   :  { %240 = vsyncpa [#allocation6], 1 }
 0x120   :  { %241 = vsyncpa [#allocation4], 1 }

</bundles_post_ra>
